<compile_context>
chip_gen: v7x
topology: tpu7x:2x2x1
jax: 0.10.0
libtpu: 0.0.40
codegen_flags: <defaults>
</compile_context>

<pallas_src>
import math
import numpy as np

import jax
import jax.numpy as jnp
from jax.experimental import pallas as pl
from jax.experimental.pallas import tpu as pltpu

NEG_SLOPE = 0.2  # nn.LeakyReLU(negative_slope=0.2)


def _leaky_relu(x):
    return jnp.where(x >= 0, x, NEG_SLOPE * x)


# ----------------------------------------------------------------------------
# Fused TreeGCN kernel: 3 matmuls per grid step, batch folded into M, lane-dense output.
# ----------------------------------------------------------------------------
def build_treegcn_kernel(node, degree, in_feature, activation):
    def kernel(x_ref, wroot_ref, wb_ref, wl_ref, bias_ref, o_ref):
        x = x_ref[...]                                              # (bt, K_all) f32

        # root: sum over levels of repeat_interleave(tree[i] @ W_root[i]) already
        # repeated by `degree` -- all folded into one packed weight.
        root = jnp.dot(x, wroot_ref[...],
                       preferred_element_type=jnp.float32)          # (bt, N*D*F_out)

        # branch: block-diagonal per-node matmul, LeakyReLU, fused W_loop (block-diag).
        x_last = x[:, : node * in_feature]                           # aligned leading lanes
        h = jnp.dot(x_last, wb_ref[...],
                    preferred_element_type=jnp.float32)              # (bt, N*D*F_in)
        h = _leaky_relu(h)
        branch = jnp.dot(h, wl_ref[...],
                         preferred_element_type=jnp.float32)         # (bt, N*D*F_out)

        y = branch + root
        if activation:
            y = _leaky_relu(y + bias_ref[...])                       # bias pre-tiled (1, N*D*F_out)
        o_ref[...] = y

    return kernel


# ----------------------------------------------------------------------------
# One-time host-side packing of PyTorch-equivalent parameters into kernel weights.
# ----------------------------------------------------------------------------
def pack_treegcn_params(params, level_nodes, *, node, degree):
    W_root = params["W_root"]                       # list of (F_i, F_out)
    W_branch = params["W_branch"]                   # (node, F_in, degree*F_in)
    W_loop = params["W_loop1"] @ params["W_loop2"]  # fused: no nonlinearity between them
    bias = params["bias"]                           # (degree, F_out)

    depth = len(W_root) - 1
    in_feature = W_branch.shape[1]
    out_feature = W_root[0].shape[1]

    # Expand W_root[i] so a single matmul produces the root already repeat-interleaved
    # over nodes and degree, in the lane-flattened (node*degree*F_out) output layout.
    def expand(w, n_i):
        rep = (node // n_i) * degree
        return jnp.kron(jnp.eye(n_i, dtype=w.dtype), jnp.tile(w, (1, rep)))

    # Row order must match xcat lane order: tree[depth] first, then levels 0..depth-1.
    blocks = [expand(W_root[depth], level_nodes[depth])]
    blocks += [expand(W_root[i], level_nodes[i]) for i in range(depth)]
    W_root_big = jnp.concatenate(blocks, axis=0)            # (K_all, node*degree*F_out)

    # Block-diagonal W_branch: (node*F_in, node*degree*F_in).
    eye_n = jnp.eye(node, dtype=W_branch.dtype)
    W_branch_bd = (eye_n[:, None, :, None] * W_branch[:, :, None, :]).reshape(
        node * in_feature, node * degree * in_feature)

    # Fused W_loop block-diagonalised over the node*degree rows.
    W_loop_bd = jnp.kron(jnp.eye(node * degree, dtype=W_loop.dtype), W_loop)

    # bias.repeat(1, node, 1), lane-flattened.
    bias_flat = jnp.tile(bias.reshape(1, degree * out_feature), (1, node))

    return dict(W_root_big=W_root_big, W_branch_bd=W_branch_bd,
                W_loop_bd=W_loop_bd, bias_flat=bias_flat)


# ----------------------------------------------------------------------------
# Wrapper: batch-tiled grid, lane-dense output, reshape back outside the kernel.
# ----------------------------------------------------------------------------
def treegcn_forward(tree, packed, *, node, degree, activation=True, batch_tile=128):
    depth = len(tree) - 1
    B = tree[0].shape[0]
    in_feature = tree[-1].shape[-1]
    NDF = packed["W_root_big"].shape[1]                  # node * degree * F_out
    out_feature = NDF // (node * degree)

    # Concatenate all tree levels along lanes: last level first (aligned branch input).
    xcat = jnp.concatenate(
        [tree[depth].reshape(B, node * in_feature)]
        + [tree[i].reshape(B, -1) for i in range(depth)], axis=1)
    K_all = xcat.shape[1]

    bt = min(B, batch_tile)
    B_pad = pl.cdiv(B, bt) * bt
    if B_pad != B:
        xcat = jnp.pad(xcat, ((0, B_pad - B), (0, 0)))

    kernel = build_treegcn_kernel(node, degree, in_feature, activation)
    out_flat = pl.pallas_call(
        kernel,
        out_shape=jax.ShapeDtypeStruct((B_pad, NDF), jnp.float32),
        grid=(B_pad // bt,),
        in_specs=[
            pl.BlockSpec((bt, K_all), lambda b: (b, 0)),
            pl.BlockSpec(packed["W_root_big"].shape, lambda b: (0, 0)),
            pl.BlockSpec(packed["W_branch_bd"].shape, lambda b: (0, 0)),
            pl.BlockSpec(packed["W_loop_bd"].shape, lambda b: (0, 0)),
            pl.BlockSpec(packed["bias_flat"].shape, lambda b: (0, 0)),
        ],
        out_specs=pl.BlockSpec((bt, NDF), lambda b: (b, 0)),
        compiler_params=pltpu.CompilerParams(
            dimension_semantics=("parallel",),
            vmem_limit_bytes=32 * 1024 * 1024),
    )(xcat, packed["W_root_big"], packed["W_branch_bd"],
      packed["W_loop_bd"], packed["bias_flat"])

    branch = out_flat[:B].reshape(B, node * degree, out_feature)
    return list(tree) + [branch]       # mimics tree.append(branch); return tree


# ----------------------------------------------------------------------------
# Deterministic parameter init (shapes from TreeGCN.__init__, upsample=True).
# ----------------------------------------------------------------------------
def init_treegcn_params(key, depth, features, degrees, support, node):
    in_feature = features[depth]
    out_feature = features[depth + 1]
    degree = degrees[depth]
    keys = jax.random.split(key, depth + 5)

    W_root = []
    for i in range(depth + 1):
        bound = 1.0 / math.sqrt(features[i])
        W_root.append(jax.random.uniform(keys[i], (features[i], out_feature),
                                         jnp.float32, -bound, bound))

    gain = math.sqrt(2.0)  # xavier_uniform with relu gain
    lim = gain * math.sqrt(6.0 / (in_feature + degree * in_feature))
    W_branch = jax.random.uniform(keys[depth + 1],
                                  (node, in_feature, degree * in_feature),
                                  jnp.float32, -lim, lim)

    b1 = 1.0 / math.sqrt(in_feature)
    W_loop1 = jax.random.uniform(keys[depth + 2], (in_feature, in_feature * support),
                                 jnp.float32, -b1, b1)
    b2 = 1.0 / math.sqrt(in_feature * support)
    W_loop2 = jax.random.uniform(keys[depth + 3], (in_feature * support, out_feature),
                                 jnp.float32, -b2, b2)

    stdv = 1.0 / math.sqrt(out_feature)
    bias = jax.random.uniform(keys[depth + 4], (degree, out_feature),
                              jnp.float32, -stdv, stdv)

    return dict(W_root=W_root, W_branch=W_branch,
                W_loop1=W_loop1, W_loop2=W_loop2, bias=bias)


# ----------------------------------------------------------------------------
# Pure-JAX reference (mirrors the PyTorch forward exactly, unfused weights).
# ----------------------------------------------------------------------------
def treegcn_reference(tree, params, *, node, degree, activation=True):
    depth = len(params["W_root"]) - 1
    B = tree[0].shape[0]
    out_feature = params["W_root"][0].shape[1]
    in_feature = tree[-1].shape[-1]

    root = 0
    for i in range(depth + 1):
        rn = tree[i].shape[1]
        rep = node // rn
        rnode = tree[i] @ params["W_root"][i]
        root = root + jnp.tile(rnode, (1, 1, rep)).reshape(B, -1, out_feature)

    branch = jnp.einsum("bnf,nfg->bng", tree[-1], params["W_branch"])
    branch = jnp.where(branch >= 0, branch, NEG_SLOPE * branch)
    branch = branch.reshape(B, node * degree, in_feature)
    branch = branch @ params["W_loop1"]
    branch = branch @ params["W_loop2"]
    branch = jnp.tile(root, (1, 1, degree)).reshape(B, -1, out_feature) + branch
    if activation:
        bias = jnp.tile(params["bias"][None], (1, node, 1))
        branch = branch + bias
        branch = jnp.where(branch >= 0, branch, NEG_SLOPE * branch)
    return branch


if __name__ == "__main__":
    # TreeGCN(depth=1, features=[16,32,64], degrees=[4,2], support=10,
    #         node=4, upsample=True, activation=True)
    depth = 1
    features = [16, 32, 64]
    degrees = [4, 2]
    support = 10
    node = degrees[0]          # nodes at current depth
    degree = degrees[depth]
    B = 2

    key = jax.random.PRNGKey(0)
    k_t0, k_t1, k_p = jax.random.split(key, 3)
    tree = [
        jax.random.normal(k_t0, (B, 1, features[0]), jnp.float32),
        jax.random.normal(k_t1, (B, node, features[1]), jnp.float32),
    ]
    params = init_treegcn_params(k_p, depth, features, degrees, support, node)
    level_nodes = [t.shape[1] for t in tree]
    packed = pack_treegcn_params(params, level_nodes, node=node, degree=degree)

    out_tree = treegcn_forward(tree, packed, node=node, degree=degree, activation=True)
    branch = out_tree[-1]
    jax.block_until_ready(branch)

    ref = treegcn_reference(tree, params, node=node, degree=degree, activation=True)
    np.testing.assert_allclose(np.asarray(branch), np.asarray(ref),
                               rtol=2e-2, atol=2e-2)
    print("KERNEL_OK")
</pallas_src>

<mosaic_0001>
module attributes {stable_mosaic.version = 11 : i64} {
  func.func @kernel(%arg0: i32, %arg1: memref<2x144xf32, #tpu.memory_space<vmem>>, %arg2: memref<144x512xf32, #tpu.memory_space<vmem>>, %arg3: memref<128x256xf32, #tpu.memory_space<vmem>>, %arg4: memref<256x512xf32, #tpu.memory_space<vmem>>, %arg5: memref<1x512xf32, #tpu.memory_space<vmem>>, %arg6: memref<2x512xf32, #tpu.memory_space<vmem>>) attributes {dimension_semantics = [#tpu.dimension_semantics<parallel>], iteration_bounds = array<i64: 1>, scalar_prefetch = 0 : i64, scratch_operands = 0 : i64, tpu.core_type = #tpu.core_type<tc>, window_params = [{transform_indices = @transform_0, window_bounds = array<i64: 2, 144>}, {pipeline_mode = #tpu.pipeline_mode<synchronous>, transform_indices = @transform_1, window_bounds = array<i64: 144, 512>}, {pipeline_mode = #tpu.pipeline_mode<synchronous>, transform_indices = @transform_2, window_bounds = array<i64: 128, 256>}, {pipeline_mode = #tpu.pipeline_mode<synchronous>, transform_indices = @transform_3, window_bounds = array<i64: 256, 512>}, {pipeline_mode = #tpu.pipeline_mode<synchronous>, transform_indices = @transform_4, window_bounds = array<i64: 1, 512>}, {transform_indices = @transform_5, window_bounds = array<i64: 2, 512>}]} {
    %c0 = arith.constant 0 : index
    %c0_0 = arith.constant 0 : index
    %0 = vector.load %arg1[%c0, %c0_0] : memref<2x144xf32, #tpu.memory_space<vmem>>, vector<2x144xf32>
    %c0_1 = arith.constant 0 : index
    %c0_2 = arith.constant 0 : index
    %1 = vector.load %arg2[%c0_1, %c0_2] : memref<144x512xf32, #tpu.memory_space<vmem>>, vector<144x512xf32>
    %cst = arith.constant dense<0.000000e+00> : vector<2x512xf32>
    %2 = tpu.matmul %0, %1, %cst {dimension_numbers = #tpu.dot_dimension_numbers<[1], [0], [0], [1], [0, 0, 1, 1], [], []>} : vector<2x144xf32>, vector<144x512xf32>, vector<2x512xf32> -> vector<2x512xf32>
    %3 = vector.extract_strided_slice %0 {offsets = [0, 0], sizes = [2, 128], strides = [1, 1]} : vector<2x144xf32> to vector<2x128xf32>
    %c0_3 = arith.constant 0 : index
    %c0_4 = arith.constant 0 : index
    %4 = vector.load %arg3[%c0_3, %c0_4] : memref<128x256xf32, #tpu.memory_space<vmem>>, vector<128x256xf32>
    %cst_5 = arith.constant dense<0.000000e+00> : vector<2x256xf32>
    %5 = tpu.matmul %3, %4, %cst_5 {dimension_numbers = #tpu.dot_dimension_numbers<[1], [0], [0], [1], [0, 0, 1, 1], [], []>} : vector<2x128xf32>, vector<128x256xf32>, vector<2x256xf32> -> vector<2x256xf32>
    %cst_6 = arith.constant 0.000000e+00 : f32
    %6 = vector.broadcast %cst_6 : f32 to vector<2x256xf32>
    %7 = arith.cmpf oge, %5, %6 : vector<2x256xf32>
    %cst_7 = arith.constant 2.000000e-01 : f32
    %8 = vector.broadcast %cst_7 : f32 to vector<2x256xf32>
    %9 = arith.mulf %8, %5 : vector<2x256xf32>
    %10 = arith.select %7, %5, %9 : vector<2x256xi1>, vector<2x256xf32>
    %c0_8 = arith.constant 0 : index
    %c0_9 = arith.constant 0 : index
    %11 = vector.load %arg4[%c0_8, %c0_9] : memref<256x512xf32, #tpu.memory_space<vmem>>, vector<256x512xf32>
    %cst_10 = arith.constant dense<0.000000e+00> : vector<2x512xf32>
    %12 = tpu.matmul %10, %11, %cst_10 {dimension_numbers = #tpu.dot_dimension_numbers<[1], [0], [0], [1], [0, 0, 1, 1], [], []>} : vector<2x256xf32>, vector<256x512xf32>, vector<2x512xf32> -> vector<2x512xf32>
    %13 = arith.addf %12, %2 : vector<2x512xf32>
    %c0_11 = arith.constant 0 : index
    %c0_12 = arith.constant 0 : index
    %14 = vector.load %arg5[%c0_11, %c0_12] : memref<1x512xf32, #tpu.memory_space<vmem>>, vector<1x512xf32>
    %15 = vector.broadcast %14 : vector<1x512xf32> to vector<2x512xf32>
    %16 = arith.addf %13, %15 : vector<2x512xf32>
    %cst_13 = arith.constant 0.000000e+00 : f32
    %17 = vector.broadcast %cst_13 : f32 to vector<2x512xf32>
    %18 = arith.cmpf oge, %16, %17 : vector<2x512xf32>
    %cst_14 = arith.constant 2.000000e-01 : f32
    %19 = vector.broadcast %cst_14 : f32 to vector<2x512xf32>
    %20 = arith.mulf %19, %16 : vector<2x512xf32>
    %21 = arith.select %18, %16, %20 : vector<2x512xi1>, vector<2x512xf32>
    %c0_15 = arith.constant 0 : index
    %c0_16 = arith.constant 0 : index
    %22 = vector.load %arg6[%c0_15, %c0_16] : memref<2x512xf32, #tpu.memory_space<vmem>>, vector<2x512xf32>
    tpu.vector_store %arg6[%c0_15, %c0_16], %21 {strides = array<i32>} : memref<2x512xf32, #tpu.memory_space<vmem>>, vector<2x512xf32>,
    return
  }
  func.func @transform_0(%arg0: i32) -> (i32, i32) {
    %c0_i32 = arith.constant 0 : i32
    %c0_i32_0 = arith.constant 0 : i32
    return %arg0, %c0_i32 : i32, i32
  }
  func.func @transform_1(%arg0: i32) -> (i32, i32) {
    %c0_i32 = arith.constant 0 : i32
    %c0_i32_0 = arith.constant 0 : i32
    %c0_i32_1 = arith.constant 0 : i32
    return %c0_i32, %c0_i32_0 : i32, i32
  }
  func.func @transform_2(%arg0: i32) -> (i32, i32) {
    %c0_i32 = arith.constant 0 : i32
    %c0_i32_0 = arith.constant 0 : i32
    %c0_i32_1 = arith.constant 0 : i32
    return %c0_i32, %c0_i32_0 : i32, i32
  }
  func.func @transform_3(%arg0: i32) -> (i32, i32) {
    %c0_i32 = arith.constant 0 : i32
    %c0_i32_0 = arith.constant 0 : i32
    %c0_i32_1 = arith.constant 0 : i32
    return %c0_i32, %c0_i32_0 : i32, i32
  }
  func.func @transform_4(%arg0: i32) -> (i32, i32) {
    %c0_i32 = arith.constant 0 : i32
    %c0_i32_0 = arith.constant 0 : i32
    %c0_i32_1 = arith.constant 0 : i32
    return %c0_i32, %c0_i32_0 : i32, i32
  }
  func.func @transform_5(%arg0: i32) -> (i32, i32) {
    %c0_i32 = arith.constant 0 : i32
    %c0_i32_0 = arith.constant 0 : i32
    return %arg0, %c0_i32 : i32, i32
  }
}

</mosaic_0001>

<bundles_post_ra>
// kernel: tpu_custom_call.1
= control target key start
LH: loop header
LB: loop body
LE: loop exit
PB: predicated region body
PF: predicated region fallthrough
CT: control target
= control target key end

     0   :  { %10 = vsyncpa [#allocation3], 0  ;;  %s1258_s0 = inlined_call_operand.hbm [shape: f32[2,144], index: 0, kind: input, shape index: {}]   ;;  %s1259_s1 = inlined_call_operand.hbm [shape: f32[144,512], index: 1, kind: input, shape index: {}]   ;;  %s1260_s2 = inlined_call_operand.hbm [shape: f32[128,256], index: 2, kind: input, shape index: {}]   ;;  %s1261_s3 = inlined_call_operand.hbm [shape: f32[256,512], index: 3, kind: input, shape index: {}]   ;;  %s1262_s4 = inlined_call_operand.vmem [shape: f32[1,512], index: 4, kind: input, shape index: {}]   ;;  %s1263_s5 = inlined_call_operand.hbm [shape: f32[2,512], index: 5, kind: output, shape index: {}]  }
   0x1   :  { %11 = vsyncpa [#allocation6], 0 }
   0x2   :  { %12 = vsyncpa [#allocation9], 0 }
   0x3   :  { %13 = vsyncpa [#allocation4], 0  ;;  %s1126_s18 = smov [#allocation5]   ;;  %s1008_s22 = scalar_lea.hbm %s1259_s1, 9216 }
   0x4   :  { %s29_s19 = sshll.u32 %s1126_s18, 4  ;;  %p1009_p0 = scmp.ne.s32.totalorder %s1259_s1, %s1008_s22  ;;  %s30_s19 = int_to_ptr.vmem [resolvable:$true] %s29_s19 }
   0x5   :  { %p1012_p1 = scmp.lt.u32.totalorder %s1008_s22, %s1259_s1 }
   0x7   :  { %p1014_p2 = pnand %p1012_p1, %p1009_p0 }
   0x9   :  { %1017 = shalt.err (!%p1014_p2)
}
   0xa   :  { %s1018_s27 = scalar_lea.vmem %s30_s19, 9216  ;;  %p1023_p4 = scmp.lt.s32.totalorder %s30_s19, %s30_s19 }
   0xb   :  { %p1019_p3 = scmp.ne.s32.totalorder %s30_s19, %s1018_s27  ;;  %p1024_p5 = scmp.lt.s32.totalorder %s1018_s27, %s1018_s27 }
   0xd   :  { %p1025_p6 = por %p1024_p5, %p1023_p4 }
   0xf   :  { %p1026_p7 = pnand %p1025_p6, %p1019_p3 }
  0x11   :  { %1029 = shalt.err (!%p1026_p7)
}
  0x12   :  { %s1127_s28 = smov 512   ;;  %s1128_s29 = smov 32  }
  0x13   :  { %35 = dma.hbm_to_vmem [thread:$0]  %s1259_s1, 9216, %s30_s19, [#allocation6], %s1127_s28, %s1127_s28, %s1128_s29  }
  0x14   :  { %s1129_s7 = smov [#allocation2]   ;;  %s1130_s9 = smov [#allocation7]  }
  0x15   :  { %s20_s8 = sshll.u32 %s1129_s7, 4  ;;  %s41_s10 = sshll.u32 %s1130_s9, 4  ;;  %s21_s8 = int_to_ptr.vmem [resolvable:$true] %s20_s8  ;;  %s42_s10 = int_to_ptr.vmem [resolvable:$true] %s41_s10 }
  0x16   :  { %s1030_s13 = scalar_lea.hbm %s1258_s0, 64 }
  0x17   :  { %p1031_p8 = scmp.ne.s32.totalorder %s1258_s0, %s1030_s13  ;;  %p1034_p9 = scmp.lt.u32.totalorder %s1030_s13, %s1258_s0 }
  0x19   :  { %p1036_p10 = pnand %p1034_p9, %p1031_p8 }
  0x1b   :  { %1039 = shalt.err (!%p1036_p10)
}
  0x1c   :  { %s1040_s1 = scalar_lea.vmem %s21_s8, 64  ;;  %p1045_p12 = scmp.lt.s32.totalorder %s21_s8, %s21_s8 }
  0x1d   :  { %p1041_p11 = scmp.ne.s32.totalorder %s21_s8, %s1040_s1  ;;  %p1046_p13 = scmp.lt.s32.totalorder %s1040_s1, %s1040_s1 }
  0x1f   :  { %p1047_p0 = por %p1046_p13, %p1045_p12 }
  0x21   :  { %p1048_p1 = pnand %p1047_p0, %p1041_p11 }
  0x23   :  { %1051 = shalt.err (!%p1048_p1)
}
  0x24   :  { %23 = dma.hbm_to_vmem [thread:$0]  %s1258_s0, 64, %s21_s8, [#allocation3]  }
  0x25   :  { %s1052_s22 = scalar_lea.hbm %s1260_s2, 4096 }
  0x26   :  { %p1053_p2 = scmp.ne.s32.totalorder %s1260_s2, %s1052_s22  ;;  %p1056_p3 = scmp.lt.u32.totalorder %s1052_s22, %s1260_s2 }
  0x28   :  { %p1058_p4 = pnand %p1056_p3, %p1053_p2 }
  0x2a   :  { %1061 = shalt.err (!%p1058_p4)
}
  0x2b   :  { %s1062_s27 = scalar_lea.vmem %s42_s10, 4096  ;;  %p1067_p6 = scmp.lt.s32.totalorder %s42_s10, %s42_s10 }
  0x2c   :  { %p1063_p5 = scmp.ne.s32.totalorder %s42_s10, %s1062_s27  ;;  %p1068_p7 = scmp.lt.s32.totalorder %s1062_s27, %s1062_s27 }
  0x2e   :  { %p1069_p8 = por %p1068_p7, %p1067_p6 }
  0x30   :  { %p1070_p9 = pnand %p1069_p8, %p1063_p5 }
  0x32   :  { %1073 = shalt.err (!%p1070_p9)
}
  0x33   :  { %s1131_s0 = smov 256   ;;  %s1132_s30 = smov 16  }
  0x34   :  { %47 = dma.hbm_to_vmem [thread:$0]  %s1260_s2, 4096, %s42_s10, [#allocation6], %s1131_s0, %s1131_s0, %s1132_s30  }
  0x35   :  { %s1133_s8 = smov [#allocation8]   ;;  %s1074_s13 = scalar_lea.hbm %s1261_s3, 16384 }
  0x36   :  { %s53_s9 = sshll.u32 %s1133_s8, 4  ;;  %p1075_p10 = scmp.ne.s32.totalorder %s1261_s3, %s1074_s13  ;;  %s54_s9 = int_to_ptr.vmem [resolvable:$true] %s53_s9 }
  0x37   :  { %p1078_p11 = scmp.lt.u32.totalorder %s1074_s13, %s1261_s3 }
  0x39   :  { %p1080_p12 = pnand %p1078_p11, %p1075_p10 }
  0x3b   :  { %1083 = shalt.err (!%p1080_p12)
}
  0x3c   :  { %s1084_s1 = scalar_lea.vmem %s54_s9, 16384  ;;  %p1089_p0 = scmp.lt.s32.totalorder %s54_s9, %s54_s9 }
  0x3d   :  { %p1085_p13 = scmp.ne.s32.totalorder %s54_s9, %s1084_s1  ;;  %p1090_p1 = scmp.lt.s32.totalorder %s1084_s1, %s1084_s1 }
  0x3f   :  { %p1091_p2 = por %p1090_p1, %p1089_p0 }
  0x41   :  { %p1092_p3 = pnand %p1091_p2, %p1085_p13 }
  0x43   :  { %1095 = shalt.err (!%p1092_p3)
}
  0x44   :  { %59 = dma.hbm_to_vmem [thread:$0]  %s1261_s3, 16384, %s54_s9, [#allocation9], %s1127_s28, %s1127_s28, %s1128_s29  }
  0x45   :  { %1118 = dma.done.wait [#allocation3], 64  }
  0x46   :  { %1119 = vsyncadd [#allocation3], 4294967232 }
  0x47   :  { %1120 = dma.done.wait [#allocation6], 13312  }
  0x48   :  { %1121 = vsyncadd [#allocation6], 4294953984 }
  0x49   :  { %1122 = dma.done.wait [#allocation9], 16384  }
  0x4a   :  { %1123 = vsyncadd [#allocation9], 4294950912  ;;  %v76_v0 = vld [vmem:[#allocation5 + $0x8] sm:$0xff]  ;;  %v75_v2 = vld [vmem:[#allocation5] sm:$0xff]  ;;  %v1134_v7 = vmov 1983009808   ;;  %v151_v9 = vlaneseq }
  0x4b   :  { %v80_v1 = vld [vmem:[#allocation5 + $0x28] sm:$0xff]  ;;  %v79_v4 = vld [vmem:[#allocation5 + $0x20] sm:$0xff]  ;;  %v149_v8 = vunpack.c.l.s4 %v1134_v7  ;;  %v1226_v32 = vld [vmem:[#allocation2] sm:$0xf]  ;;  %vm157_vm0 = vcmask 130048  }
  0x4c   :  { %v761_v3 = vpack.c.bf16 %v80_v1, %v76_v0  ;;  %v84_v5 = vld [vmem:[#allocation5 + $0x48] sm:$0xff]  ;;  %v763_v10 = vpack.c.bf16 %v79_v4, %v75_v2  ;;  %v83_v12 = vld [vmem:[#allocation5 + $0x40] sm:$0xff]  ;;  %v1221_v21 = vshrl.u32 %v151_v9, 7  ;;  %v78_v54 = vld [vmem:[#allocation5 + $0x18] sm:$0xff] }
  0x4d   :  { %v88_v6 = vld [vmem:[#allocation5 + $0x68] sm:$0xff]  ;;  %v87_v13 = vld [vmem:[#allocation5 + $0x60] sm:$0xff]  ;;  %v150_v20 = vunpack.c.0.s8 %v149_v8  ;;  %v82_v55 = vld [vmem:[#allocation5 + $0x38] sm:$0xff] }
  0x4e   :  { %v765_v11 = vpack.c.bf16 %v88_v6, %v84_v5  ;;  %v92_v14 = vld [vmem:[#allocation5 + $0x88] sm:$0xff]  ;;  %762 = vmatprep.subr.bf16.mxu0 %v761_v3  ;;  %v767_v16 = vpack.c.bf16 %v87_v13, %v83_v12  ;;  %v91_v18 = vld [vmem:[#allocation5 + $0x80] sm:$0xff]  ;;  %v77_v56 = vld [vmem:[#allocation5 + $0x10] sm:$0xff]  ;;  %v797_v58 = vpack.c.bf16 %v82_v55, %v78_v54 }
  0x4f   :  { %v96_v15 = vld [vmem:[#allocation5 + $0xa8] sm:$0xff]  ;;  %764 = vmatpush1.bf16.msra.mxu0 %v763_v10  ;;  %v95_v19 = vld [vmem:[#allocation5 + $0xa0] sm:$0xff]  ;;  %v1224_v28 = vsub.s32 %v150_v20, %v1221_v21  ;;  %v81_v59 = vld [vmem:[#allocation5 + $0x30] sm:$0xff] }
  0x50   :  { %766 = vmatprep.subr.bf16.mxu0 %v765_v11  ;;  %v769_v17 = vpack.c.bf16 %v96_v15, %v92_v14  ;;  %v100_v22 = vld [vmem:[#allocation5 + $0xc8] sm:$0xff]  ;;  %v771_v24 = vpack.c.bf16 %v95_v19, %v91_v18  ;;  %v99_v26 = vld [vmem:[#allocation5 + $0xc0] sm:$0xff]  ;;  %v86_v60 = vld [vmem:[#allocation5 + $0x58] sm:$0xff]  ;;  %v799_v63 = vpack.c.bf16 %v81_v59, %v77_v56  ;;  %798 = vmatprep.subr.bf16.mxu1 %v797_v58 }
  0x51   :  { %v104_v23 = vld [vmem:[#allocation5 + $0xe8] sm:$0xff]  ;;  %v103_v27 = vld [vmem:[#allocation5 + $0xe0] sm:$0xff]  ;;  %v1230_v36 = vrot.slane %v1226_v32, %v1224_v28  ;;  %v90_v61 = vld [vmem:[#allocation5 + $0x78] sm:$0xff] }
  0x52   :  { %v773_v25 = vpack.c.bf16 %v104_v23, %v100_v22  ;;  %v108_v29 = vld [vmem:[#allocation5 + $0x108] sm:$0xff]  ;;  %v775_v31 = vpack.c.bf16 %v103_v27, %v99_v26  ;;  %v107_v34 = vld [vmem:[#allocation5 + $0x100] sm:$0xff]  ;;  %v801_v0 = vpack.c.bf16 %v90_v61, %v86_v60  ;;  %v85_v1 = vld [vmem:[#allocation5 + $0x50] sm:$0xff]  ;;  %800 = vmatpush1.bf16.msra.mxu1 %v799_v63 }
  0x53   :  { %768 = vmatpush1.bf16.msra.mxu0 %v767_v16  ;;  %v112_v30 = vld [vmem:[#allocation5 + $0x128] sm:$0xff]  ;;  %v111_v35 = vld [vmem:[#allocation5 + $0x120] sm:$0xff]  ;;  %v155_v39 = vcombine.high %v1230_v36, %v1230_v36  ;;  %v89_v2 = vld [vmem:[#allocation5 + $0x70] sm:$0xff] }
  0x54   :  { %770 = vmatprep.subr.bf16.mxu0 %v769_v17  ;;  %v777_v33 = vpack.c.bf16 %v112_v30, %v108_v29  ;;  %v116_v37 = vld [vmem:[#allocation5 + $0x148] sm:$0xff]  ;;  %v779_v40 = vpack.c.bf16 %v111_v35, %v107_v34  ;;  %v115_v42 = vld [vmem:[#allocation5 + $0x140] sm:$0xff]  ;;  %v94_v3 = vld [vmem:[#allocation5 + $0x98] sm:$0xff]  ;;  %v803_v7 = vpack.c.bf16 %v89_v2, %v85_v1  ;;  %802 = vmatprep.subr.bf16.mxu1 %v801_v0 }
  0x55   :  { %v120_v38 = vld [vmem:[#allocation5 + $0x168] sm:$0xff]  ;;  %v119_v43 = vld [vmem:[#allocation5 + $0x160] sm:$0xff]  ;;  %759 = vmatprep.mubr.msk.f32.mxu0 %vm157_vm0, %v155_v39  ;;  %760 = vmatprep.mubr.msk.f32.mxu1 %vm157_vm0, %v155_v39  ;;  %v98_v6 = vld [vmem:[#allocation5 + $0xb8] sm:$0xff] }
  0x56   :  { %v781_v41 = vpack.c.bf16 %v120_v38, %v116_v37  ;;  %v124_v44 = vld [vmem:[#allocation5 + $0x188] sm:$0xff]  ;;  %v783_v46 = vpack.c.bf16 %v119_v43, %v115_v42  ;;  %v123_v48 = vld [vmem:[#allocation5 + $0x180] sm:$0xff]  ;;  %v805_v10 = vpack.c.bf16 %v98_v6, %v94_v3  ;;  %v93_v11 = vld [vmem:[#allocation5 + $0x90] sm:$0xff]  ;;  %804 = vmatpush1.bf16.msra.mxu1 %v803_v7 }
  0x57   :  { %772 = vmatpush1.bf16.msra.mxu0 %v771_v24  ;;  %v128_v45 = vld [vmem:[#allocation5 + $0x1a8] sm:$0xff]  ;;  %v127_v49 = vld [vmem:[#allocation5 + $0x1a0] sm:$0xff]  ;;  %v97_v12 = vld [vmem:[#allocation5 + $0xb0] sm:$0xff] }
  0x58   :  { %774 = vmatprep.subr.bf16.mxu0 %v773_v25  ;;  %v785_v47 = vpack.c.bf16 %v128_v45, %v124_v44  ;;  %v132_v50 = vld [vmem:[#allocation5 + $0x1c8] sm:$0xff]  ;;  %v131_v52 = vld [vmem:[#allocation5 + $0x1c0] sm:$0xff]  ;;  %v787_v57 = vpack.c.bf16 %v127_v49, %v123_v48  ;;  %v102_v15 = vld [vmem:[#allocation5 + $0xd8] sm:$0xff]  ;;  %v807_v19 = vpack.c.bf16 %v97_v12, %v93_v11  ;;  %806 = vmatprep.subr.bf16.mxu1 %v805_v10 }
  0x59   :  { %v136_v51 = vld [vmem:[#allocation5 + $0x1e8] sm:$0xff]  ;;  %v135_v53 = vld [vmem:[#allocation5 + $0x1e0] sm:$0xff]  ;;  %v106_v16 = vld [vmem:[#allocation5 + $0xf8] sm:$0xff] }
  0x5a   :  { %v789_v62 = vpack.c.bf16 %v136_v51, %v132_v50  ;;  %v140_v4 = vld [vmem:[#allocation5 + $0x208] sm:$0xff]  ;;  %v791_v8 = vpack.c.bf16 %v135_v53, %v131_v52  ;;  %v139_v9 = vld [vmem:[#allocation5 + $0x200] sm:$0xff]  ;;  %v305_v18 = vld [vmem:[#allocation7 + $0x18] sm:$0xff]  ;;  %v809_v22 = vpack.c.bf16 %v106_v16, %v102_v15  ;;  %808 = vmatpush1.bf16.msra.mxu1 %v807_v19  ;;  %v1135_v50 = vmov 0.0  }
  0x5b   :  { %776 = vmatpush1.bf16.msra.mxu0 %v775_v31  ;;  %v144_v5 = vld [vmem:[#allocation5 + $0x228] sm:$0xff]  ;;  %v143_v14 = vld [vmem:[#allocation5 + $0x220] sm:$0xff]  ;;  %v101_v23 = vld [vmem:[#allocation5 + $0xd0] sm:$0xff] }
  0x5c   :  { %778 = vmatprep.subr.bf16.mxu0 %v777_v33  ;;  %v793_v13 = vpack.c.bf16 %v144_v5, %v140_v4  ;;  %v303_v17 = vld [vmem:[#allocation7 + $0x8] sm:$0xff]  ;;  %v795_v20 = vpack.c.bf16 %v143_v14, %v139_v9  ;;  %v105_v24 = vld [vmem:[#allocation5 + $0xf0] sm:$0xff]  ;;  %v302_v26 = vld [vmem:[#allocation7] sm:$0xff]  ;;  %810 = vmatprep.subr.bf16.mxu1 %v809_v22 }
  0x5d   :  { %v833_v25 = vpack.c.bf16 %v305_v18, %v303_v17  ;;  %v304_v27 = vld [vmem:[#allocation7 + $0x10] sm:$0xff]  ;;  %v307_v29 = vld [vmem:[#allocation7 + $0x28] sm:$0xff]  ;;  %v309_v30 = vld [vmem:[#allocation7 + $0x38] sm:$0xff]  ;;  %v811_v34 = vpack.c.bf16 %v105_v24, %v101_v23 }
  0x5e   :  { %v110_v31 = vld [vmem:[#allocation5 + $0x118] sm:$0xff]  ;;  %v835_v35 = vpack.c.bf16 %v304_v27, %v302_v26  ;;  %v306_v37 = vld [vmem:[#allocation7 + $0x20] sm:$0xff]  ;;  %v109_v38 = vld [vmem:[#allocation5 + $0x110] sm:$0xff] }
  0x5f   :  { %780 = vmatpush1.bf16.msra.mxu0 %v779_v40  ;;  %v114_v33 = vld [vmem:[#allocation5 + $0x138] sm:$0xff]  ;;  %v113_v39 = vld [vmem:[#allocation5 + $0x130] sm:$0xff]  ;;  %v837_v40 = vpack.c.bf16 %v309_v30, %v307_v29  ;;  %v311_v45 = vld [vmem:[#allocation7 + $0x48] sm:$0xff]  ;;  %812 = vmatpush1.bf16.msra.mxu1 %v811_v34 }
  0x60   :  { %782 = vmatprep.subr.bf16.mxu0 %v781_v41  ;;  %v308_v41 = vld [vmem:[#allocation7 + $0x30] sm:$0xff]  ;;  %v813_v42 = vpack.c.bf16 %v114_v33, %v110_v31  ;;  %v118_v43 = vld [vmem:[#allocation5 + $0x158] sm:$0xff]  ;;  %v310_v49 = vld [vmem:[#allocation7 + $0x40] sm:$0xff] }
  0x61   :  { %v122_v44 = vld [vmem:[#allocation5 + $0x178] sm:$0xff]  ;;  %v839_v48 = vpack.c.bf16 %v308_v41, %v306_v37  ;;  %v117_v52 = vld [vmem:[#allocation5 + $0x150] sm:$0xff]  ;;  %v315_v58 = vld [vmem:[#allocation7 + $0x68] sm:$0xff] }
  0x62   :  { %v817_v51 = vpack.c.bf16 %v122_v44, %v118_v43  ;;  %v121_v53 = vld [vmem:[#allocation5 + $0x170] sm:$0xff]  ;;  %814 = vmatprep.subr.bf16.mxu1 %v813_v42  ;;  %v126_v56 = vld [vmem:[#allocation5 + $0x198] sm:$0xff]  ;;  %v319_v6 = vld [vmem:[#allocation7 + $0x88] sm:$0xff] }
  0x63   :  { %784 = vmatpush1.bf16.msra.mxu0 %v783_v46  ;;  %v313_v46 = vld [vmem:[#allocation7 + $0x58] sm:$0xff]  ;;  %v312_v55 = vld [vmem:[#allocation7 + $0x50] sm:$0xff]  ;;  %v819_v60 = vpack.c.bf16 %v121_v53, %v117_v52  ;;  %v318_v10 = vld [vmem:[#allocation7 + $0x80] sm:$0xff] }
  0x64   :  { %786 = vmatprep.subr.bf16.mxu0 %v785_v47  ;;  %v815_v47 = vpack.c.bf16 %v113_v39, %v109_v38  ;;  %v841_v54 = vpack.c.bf16 %v313_v46, %v311_v45  ;;  %v317_v59 = vld [vmem:[#allocation7 + $0x78] sm:$0xff]  ;;  %v843_v61 = vpack.c.bf16 %v312_v55, %v310_v49  ;;  %v125_v0 = vld [vmem:[#allocation5 + $0x190] sm:$0xff]  ;;  %v323_v18 = vld [vmem:[#allocation7 + $0xa8] sm:$0xff] }
  0x65   :  { %v129_v1 = vld [vmem:[#allocation5 + $0x1b0] sm:$0xff]  ;;  %v845_v2 = vpack.c.bf16 %v317_v59, %v315_v58  ;;  %v134_v4 = vld [vmem:[#allocation5 + $0x1d8] sm:$0xff]  ;;  %v322_v23 = vld [vmem:[#allocation7 + $0xa0] sm:$0xff] }
  0x66   :  { %816 = vmatpush1.bf16.msra.mxu1 %v815_v47  ;;  %v316_v3 = vld [vmem:[#allocation7 + $0x70] sm:$0xff]  ;;  %v138_v5 = vld [vmem:[#allocation5 + $0x1f8] sm:$0xff]  ;;  %v327_v33 = vld [vmem:[#allocation7 + $0xc8] sm:$0xff] }
  0x67   :  { %788 = vmatpush1.bf16.msra.mxu0 %v787_v57  ;;  %v130_v57 = vld [vmem:[#allocation5 + $0x1b8] sm:$0xff]  ;;  %818 = vmatprep.subr.bf16.mxu1 %v817_v51  ;;  %v825_v11 = vpack.c.bf16 %v138_v5, %v134_v4  ;;  %v133_v12 = vld [vmem:[#allocation5 + $0x1d0] sm:$0xff]  ;;  %v326_v38 = vld [vmem:[#allocation7 + $0xc0] sm:$0xff] }
  0x68   :  { %790 = vmatprep.subr.bf16.mxu0 %v789_v62  ;;  %v314_v62 = vld [vmem:[#allocation7 + $0x60] sm:$0xff]  ;;  %v821_v63 = vpack.c.bf16 %v130_v57, %v126_v56  ;;  %v321_v7 = vld [vmem:[#allocation7 + $0x98] sm:$0xff]  ;;  %v320_v15 = vld [vmem:[#allocation7 + $0x90] sm:$0xff] }
  0x69   :  { %v847_v9 = vpack.c.bf16 %v316_v3, %v314_v62  ;;  %v849_v14 = vpack.c.bf16 %v321_v7, %v319_v6  ;;  %v142_v16 = vld [vmem:[#allocation5 + $0x218] sm:$0xff]  ;;  %v851_v22 = vpack.c.bf16 %v320_v15, %v318_v10  ;;  %v145_v26 = vld [vmem:[#allocation5 + $0x230] sm:$0xff]  ;;  %v331_v46 = vld [vmem:[#allocation7 + $0xe8] sm:$0xff] }
  0x6a   :  { %820 = vmatpush1.bf16.msra.mxu1 %v819_v60  ;;  %v146_v17 = vld [vmem:[#allocation5 + $0x238] sm:$0xff]  ;;  %v324_v29 = vld [vmem:[#allocation7 + $0xb0] sm:$0xff]  ;;  %v412_v58 = vld [vmem:[#allocation8 + $0x8] sm:$0xff] }
  0x6b   :  { %792 = vmatpush1.bf16.msra.mxu0 %v791_v8  ;;  %v823_v8 = vpack.c.bf16 %v129_v1, %v125_v0  ;;  %822 = vmatprep.subr.bf16.mxu1 %v821_v63  ;;  %v325_v19 = vld [vmem:[#allocation7 + $0xb8] sm:$0xff]  ;;  %v829_v24 = vpack.c.bf16 %v146_v17, %v142_v16  ;;  %v855_v37 = vpack.c.bf16 %v324_v29, %v322_v23  ;;  %v417_v41 = vld [vmem:[#allocation8 + $0x30] sm:$0xff]  ;;  %v416_v59 = vld [vmem:[#allocation8 + $0x28] sm:$0xff] }
  0x6c   :  { %794 = vmatprep.subr.bf16.mxu0 %v793_v13  ;;  %v137_v13 = vld [vmem:[#allocation5 + $0x1f0] sm:$0xff]  ;;  %v853_v27 = vpack.c.bf16 %v325_v19, %v323_v18  ;;  %v414_v30 = vld [vmem:[#allocation8 + $0x18] sm:$0xff]  ;;  %v411_v62 = vld [vmem:[#allocation8] sm:$0xff] }
  0x6d   :  { %v418_v31 = vld [vmem:[#allocation8 + $0x38] sm:$0xff]  ;;  %v328_v43 = vld [vmem:[#allocation7 + $0xd0] sm:$0xff]  ;;  %v415_v3 = vld [vmem:[#allocation8 + $0x20] sm:$0xff] }
  0x6e   :  { %824 = vmatpush1.bf16.msra.mxu1 %v823_v8  ;;  %v329_v34 = vld [vmem:[#allocation7 + $0xd8] sm:$0xff]  ;;  %v929_v39 = vpack.c.bf16 %v418_v31, %v414_v30  ;;  %v859_v49 = vpack.c.bf16 %v328_v43, %v326_v38  ;;  %v421_v52 = vld [vmem:[#allocation8 + $0x50] sm:$0xff]  ;;  %v420_v6 = vld [vmem:[#allocation8 + $0x48] sm:$0xff] }
  0x6f   :  { %796 = vmatpush1.bf16.msra.mxu0 %v795_v20  ;;  %v827_v20 = vpack.c.bf16 %v137_v13, %v133_v12  ;;  %826 = vmatprep.subr.bf16.mxu1 %v825_v11  ;;  %v857_v42 = vpack.c.bf16 %v329_v34, %v327_v33  ;;  %v422_v44 = vld [vmem:[#allocation8 + $0x58] sm:$0xff]  ;;  %v425_v53 = vld [vmem:[#allocation8 + $0x70] sm:$0xff]  ;;  %v424_v7 = vld [vmem:[#allocation8 + $0x68] sm:$0xff] }
  0x70   :  { %834 = vmatprep.subr.bf16.mxu0 %v833_v25  ;;  %v141_v25 = vld [vmem:[#allocation5 + $0x210] sm:$0xff]  ;;  %v426_v45 = vld [vmem:[#allocation8 + $0x78] sm:$0xff]  ;;  %v935_v60 = vpack.c.bf16 %v425_v53, %v421_v52  ;;  %v869_v13 = vpack.c.bf16 %v424_v7, %v420_v6  ;;  %v428_v17 = vld [vmem:[#allocation8 + $0x88] sm:$0xff] }
  0x71   :  { %v333_v47 = vld [vmem:[#allocation7 + $0xf8] sm:$0xff]  ;;  %v933_v51 = vpack.c.bf16 %v426_v45, %v422_v44  ;;  %v332_v55 = vld [vmem:[#allocation7 + $0xf0] sm:$0xff]  ;;  %v432_v18 = vld [vmem:[#allocation8 + $0xa8] sm:$0xff] }
  0x72   :  { %225 = vmatmul.mubr.f32.vlgmr.msra.gmra.mrb[0].mxu0 %v1230_v36  ;;  %828 = vmatpush1.bf16.msra.mxu1 %v827_v20  ;;  %v430_v56 = vld [vmem:[#allocation8 + $0x98] sm:$0xff]  ;;  %v429_v0 = vld [vmem:[#allocation8 + $0x90] sm:$0xff]  ;;  %v436_v31 = vld [vmem:[#allocation8 + $0xc8] sm:$0xff] }
  0x73   :  { %836 = vmatpush1.bf16.msra.mxu0 %v835_v35  ;;  %398 = vmatprep.mubr.f32.mxu0 %v1135_v50  ;;  %v831_v35 = vpack.c.bf16 %v145_v26, %v141_v25  ;;  %v330_v50 = vld [vmem:[#allocation7 + $0xe0] sm:$0xff]  ;;  %v434_v57 = vld [vmem:[#allocation8 + $0xb8] sm:$0xff]  ;;  %v433_v1 = vld [vmem:[#allocation8 + $0xb0] sm:$0xff]  ;;  %v873_v26 = vpack.c.bf16 %v432_v18, %v428_v17 }
  0x74   :  { %838 = vmatprep.subr.bf16.mxu0 %v837_v40  ;;  %830 = vmatprep.subr.bf16.mxu1 %v829_v24  ;;  %v413_v40 = vld [vmem:[#allocation8 + $0x10] sm:$0xff]  ;;  %v937_v63 = vpack.c.bf16 %v434_v57, %v430_v56  ;;  %v438_v4 = vld [vmem:[#allocation8 + $0xd8] sm:$0xff]  ;;  %v939_v8 = vpack.c.bf16 %v433_v1, %v429_v0  ;;  %v440_v33 = vld [vmem:[#allocation8 + $0xe8] sm:$0xff] }
  0x75   :  { %v442_v5 = vld [vmem:[#allocation8 + $0xf8] sm:$0xff]  ;;  %v437_v11 = vld [vmem:[#allocation8 + $0xd0] sm:$0xff]  ;;  %v444_v44 = vld [vmem:[#allocation8 + $0x108] sm:$0xff] }
  0x76   :  { %832 = vmatpush1.bf16.msra.mxu1 %v831_v35  ;;  %v941_v10 = vpack.c.bf16 %v442_v5, %v438_v4  ;;  %v441_v12 = vld [vmem:[#allocation8 + $0xf0] sm:$0xff]  ;;  %v446_v15 = vld [vmem:[#allocation8 + $0x118] sm:$0xff]  ;;  %v435_v35 = vld [vmem:[#allocation8 + $0xc0] sm:$0xff] }
  0x77   :  { %840 = vmatpush1.bf16.msra.mxu0 %v839_v48  ;;  %v931_v48 = vpack.c.bf16 %v417_v41, %v413_v40  ;;  %930 = vmatprep.subr.bf16.mxu1 %v929_v39  ;;  %v450_v16 = vld [vmem:[#allocation8 + $0x138] sm:$0xff]  ;;  %v943_v19 = vpack.c.bf16 %v441_v12, %v437_v11  ;;  %v445_v24 = vld [vmem:[#allocation8 + $0x110] sm:$0xff]  ;;  %v877_v40 = vpack.c.bf16 %v440_v33, %v436_v31  ;;  %v439_v41 = vld [vmem:[#allocation8 + $0xe0] sm:$0xff] }
  0x78   :  { %842 = vmatprep.subr.bf16.mxu0 %v841_v54  ;;  %v861_v54 = vpack.c.bf16 %v333_v47, %v331_v46  ;;  %v945_v23 = vpack.c.bf16 %v450_v16, %v446_v15  ;;  %v449_v25 = vld [vmem:[#allocation8 + $0x130] sm:$0xff]  ;;  %v454_v29 = vld [vmem:[#allocation8 + $0x158] sm:$0xff]  ;;  %v448_v45 = vld [vmem:[#allocation8 + $0x128] sm:$0xff]  ;;  %v879_v47 = vpack.c.bf16 %v439_v41, %v435_v35 }
  0x79   :  { %296 = vmatmul.mubr.f32.vlgmr.msra.gmra.mrb[0].mxu1 %v1230_v36  ;;  %v867_v36 = vpack.c.bf16 %v415_v3, %v411_v62  ;;  %v458_v30 = vld [vmem:[#allocation8 + $0x178] sm:$0xff]  ;;  %v947_v34 = vpack.c.bf16 %v449_v25, %v445_v24  ;;  %v453_v38 = vld [vmem:[#allocation8 + $0x150] sm:$0xff]  ;;  %v881_v52 = vpack.c.bf16 %v448_v45, %v444_v44  ;;  %v447_v53 = vld [vmem:[#allocation8 + $0x120] sm:$0xff] }
  0x7a   :  { %932 = vmatpush1.bf16.msra.mxu1 %v931_v48  ;;  %v457_v39 = vld [vmem:[#allocation8 + $0x170] sm:$0xff]  ;;  %v466_v43 = vld [vmem:[#allocation8 + $0x1b8] sm:$0xff]  ;;  %v443_v48 = vld [vmem:[#allocation8 + $0x100] sm:$0xff] }
  0x7b   :  { %844 = vmatpush1.bf16.msra.mxu0 %v843_v61  ;;  %v863_v61 = vpack.c.bf16 %v332_v55, %v330_v50  ;;  %934 = vmatprep.subr.bf16.mxu1 %v933_v51  ;;  %v951_v46 = vpack.c.bf16 %v457_v39, %v453_v38  ;;  %v461_v50 = vld [vmem:[#allocation8 + $0x190] sm:$0xff]  ;;  %v474_v55 = vld [vmem:[#allocation8 + $0x1f8] sm:$0xff]  ;;  %v452_v56 = vld [vmem:[#allocation8 + $0x148] sm:$0xff] }
  0x7c   :  { %846 = vmatprep.subr.bf16.mxu0 %v845_v2  ;;  %v865_v2 = vpack.c.bf16 %v416_v59, %v412_v58  ;;  %v465_v51 = vld [vmem:[#allocation8 + $0x1b0] sm:$0xff]  ;;  %v456_v57 = vld [vmem:[#allocation8 + $0x168] sm:$0xff]  ;;  %v883_v59 = vpack.c.bf16 %v447_v53, %v443_v48  ;;  %v455_v1 = vld [vmem:[#allocation8 + $0x160] sm:$0xff] }
  0x7d   :  { %v955_v58 = vpack.c.bf16 %v465_v51, %v461_v50  ;;  %v469_v62 = vld [vmem:[#allocation8 + $0x1d0] sm:$0xff]  ;;  %v885_v0 = vpack.c.bf16 %v456_v57, %v452_v56  ;;  %v482_v3 = vld [vmem:[#allocation8 + $0x238] sm:$0xff]  ;;  %v460_v4 = vld [vmem:[#allocation8 + $0x188] sm:$0xff] }
  0x7e   :  { %936 = vmatpush1.bf16.msra.mxu1 %v935_v60  ;;  %v451_v60 = vld [vmem:[#allocation8 + $0x140] sm:$0xff]  ;;  %v464_v5 = vld [vmem:[#allocation8 + $0x1a8] sm:$0xff]  ;;  %v493_v35 = vld [vmem:[#allocation8 + $0x290] sm:$0xff] }
  0x7f   :  { %848 = vmatpush1.bf16.msra.mxu0 %v847_v9  ;;  %v419_v9 = vld [vmem:[#allocation8 + $0x40] sm:$0xff]  ;;  %938 = vmatprep.subr.bf16.mxu1 %v937_v63  ;;  %v473_v63 = vld [vmem:[#allocation8 + $0x1f0] sm:$0xff]  ;;  %v887_v7 = vpack.c.bf16 %v455_v1, %v451_v60  ;;  %v889_v11 = vpack.c.bf16 %v464_v5, %v460_v4  ;;  %v468_v15 = vld [vmem:[#allocation8 + $0x1c8] sm:$0xff] }
  0x80   :  { %850 = vmatprep.subr.bf16.mxu0 %v849_v14  ;;  %v423_v14 = vld [vmem:[#allocation8 + $0x60] sm:$0xff]  ;;  %v959_v6 = vpack.c.bf16 %v473_v63, %v469_v62  ;;  %v472_v16 = vld [vmem:[#allocation8 + $0x1e8] sm:$0xff]  ;;  %v506_v41 = vld [vmem:[#allocation8 + $0x2f8] sm:$0xff] }
  0x81   :  { %v871_v20 = vpack.c.bf16 %v423_v14, %v419_v9  ;;  %v477_v9 = vld [vmem:[#allocation8 + $0x210] sm:$0xff]  ;;  %v463_v12 = vld [vmem:[#allocation8 + $0x1a0] sm:$0xff]  ;;  %v490_v14 = vld [vmem:[#allocation8 + $0x278] sm:$0xff]  ;;  %v893_v24 = vpack.c.bf16 %v472_v16, %v468_v15 }
  0x82   :  { %940 = vmatpush1.bf16.msra.mxu1 %v939_v8  ;;  %v459_v8 = vld [vmem:[#allocation8 + $0x180] sm:$0xff]  ;;  %v501_v48 = vld [vmem:[#allocation8 + $0x2d0] sm:$0xff]  ;;  %v514_v53 = vld [vmem:[#allocation8 + $0x338] sm:$0xff] }
  0x83   :  { %852 = vmatpush1.bf16.msra.mxu0 %v851_v22  ;;  %v427_v22 = vld [vmem:[#allocation8 + $0x80] sm:$0xff]  ;;  %942 = vmatprep.subr.bf16.mxu1 %v941_v10  ;;  %v481_v10 = vld [vmem:[#allocation8 + $0x230] sm:$0xff]  ;;  %v891_v18 = vpack.c.bf16 %v463_v12, %v459_v8  ;;  %v522_v1 = vld [vmem:[#allocation8 + $0x378] sm:$0xff] }
  0x84   :  { %854 = vmatprep.subr.bf16.mxu0 %v853_v27  ;;  %v431_v27 = vld [vmem:[#allocation8 + $0xa0] sm:$0xff]  ;;  %v963_v17 = vpack.c.bf16 %v481_v10, %v477_v9  ;;  %v509_v60 = vld [vmem:[#allocation8 + $0x310] sm:$0xff]  ;;  %v530_v12 = vld [vmem:[#allocation8 + $0x3b8] sm:$0xff] }
  0x85   :  { %v471_v25 = vld [vmem:[#allocation8 + $0x1e0] sm:$0xff]  ;;  %v517_v8 = vld [vmem:[#allocation8 + $0x350] sm:$0xff] }
  0x86   :  { %944 = vmatpush1.bf16.msra.mxu1 %v943_v19  ;;  %v467_v19 = vld [vmem:[#allocation8 + $0x1c0] sm:$0xff] }
  0x87   :  { %856 = vmatpush1.bf16.msra.mxu0 %v855_v37  ;;  %946 = vmatprep.subr.bf16.mxu1 %v945_v23  ;;  %v949_v37 = vpack.c.bf16 %v458_v30, %v454_v29  ;;  %v489_v23 = vld [vmem:[#allocation8 + $0x270] sm:$0xff]  ;;  %v476_v29 = vld [vmem:[#allocation8 + $0x208] sm:$0xff]  ;;  %v895_v33 = vpack.c.bf16 %v471_v25, %v467_v19  ;;  %v479_v39 = vld [vmem:[#allocation8 + $0x220] sm:$0xff] }
  0x88   :  { %858 = vmatprep.subr.bf16.mxu0 %v857_v42  ;;  %v462_v42 = vld [vmem:[#allocation8 + $0x198] sm:$0xff]  ;;  %v480_v30 = vld [vmem:[#allocation8 + $0x228] sm:$0xff]  ;;  %v487_v51 = vld [vmem:[#allocation8 + $0x260] sm:$0xff] }
  0x89   :  { %v897_v38 = vpack.c.bf16 %v480_v30, %v476_v29  ;;  %v495_v63 = vld [vmem:[#allocation8 + $0x2a0] sm:$0xff]  ;;  %v529_v19 = vld [vmem:[#allocation8 + $0x3b0] sm:$0xff]  ;;  %v520_v25 = vld [vmem:[#allocation8 + $0x368] sm:$0xff] }
  0x8a   :  { %948 = vmatpush1.bf16.msra.mxu1 %v947_v34  ;;  %v475_v34 = vld [vmem:[#allocation8 + $0x200] sm:$0xff] }
  0x8b   :  { %860 = vmatpush1.bf16.msra.mxu0 %v859_v49  ;;  %950 = vmatprep.subr.bf16.mxu1 %v949_v37  ;;  %v953_v49 = vpack.c.bf16 %v466_v43, %v462_v42  ;;  %v497_v37 = vld [vmem:[#allocation8 + $0x2b0] sm:$0xff]  ;;  %v484_v42 = vld [vmem:[#allocation8 + $0x248] sm:$0xff]  ;;  %v899_v45 = vpack.c.bf16 %v479_v39, %v475_v34  ;;  %v503_v10 = vld [vmem:[#allocation8 + $0x2e0] sm:$0xff] }
  0x8c   :  { %862 = vmatprep.subr.bf16.mxu0 %v861_v54  ;;  %v470_v54 = vld [vmem:[#allocation8 + $0x1d8] sm:$0xff]  ;;  %v488_v43 = vld [vmem:[#allocation8 + $0x268] sm:$0xff]  ;;  %v971_v44 = vpack.c.bf16 %v497_v37, %v493_v35  ;;  %v515_v30 = vld [vmem:[#allocation8 + $0x340] sm:$0xff] }
  0x8d   :  { %v901_v50 = vpack.c.bf16 %v488_v43, %v484_v42  ;;  %v528_v34 = vld [vmem:[#allocation8 + $0x3a8] sm:$0xff]  ;;  %v523_v37 = vld [vmem:[#allocation8 + $0x380] sm:$0xff]  ;;  %v534_v42 = vld [vmem:[#allocation8 + $0x3d8] sm:$0xff] }
  0x8e   :  { %952 = vmatpush1.bf16.msra.mxu1 %v951_v46  ;;  %v483_v46 = vld [vmem:[#allocation8 + $0x240] sm:$0xff] }
  0x8f   :  { %864 = vmatpush1.bf16.msra.mxu0 %v863_v61  ;;  %954 = vmatprep.subr.bf16.mxu1 %v953_v49  ;;  %v957_v61 = vpack.c.bf16 %v474_v55, %v470_v54  ;;  %v505_v49 = vld [vmem:[#allocation8 + $0x2f0] sm:$0xff]  ;;  %v492_v54 = vld [vmem:[#allocation8 + $0x288] sm:$0xff]  ;;  %v903_v57 = vpack.c.bf16 %v487_v51, %v483_v46  ;;  %v535_v46 = vld [vmem:[#allocation8 + $0x3e0] sm:$0xff] }
  0x90   :  { %866 = vmatprep.subr.bf16.mxu0 %v865_v2  ;;  %v478_v2 = vld [vmem:[#allocation8 + $0x218] sm:$0xff]  ;;  %v496_v55 = vld [vmem:[#allocation8 + $0x2a8] sm:$0xff]  ;;  %v975_v56 = vpack.c.bf16 %v505_v49, %v501_v48  ;;  %v533_v49 = vld [vmem:[#allocation8 + $0x3d0] sm:$0xff] }
  0x91   :  { %v905_v62 = vpack.c.bf16 %v496_v55, %v492_v54 }
  0x92   :  { %399 = vmatmul.mubr.f32.vlgmr.msra.gmra.mrb[2].mxu0 %v1226_v32  ;;  %v875_v32 = vpack.c.bf16 %v431_v27, %v427_v22  ;;  %956 = vmatpush1.bf16.msra.mxu1 %v955_v58  ;;  %v485_v22 = vld [vmem:[#allocation8 + $0x250] sm:$0xff]  ;;  %v498_v27 = vld [vmem:[#allocation8 + $0x2b8] sm:$0xff]  ;;  %v491_v58 = vld [vmem:[#allocation8 + $0x280] sm:$0xff] }
  0x93   :  { %868 = vmatpush1.bf16.msra.mxu0 %v867_v36  ;;  %958 = vmatprep.subr.bf16.mxu1 %v957_v61  ;;  %v961_v36 = vpack.c.bf16 %v482_v3, %v478_v2  ;;  %v967_v31 = vpack.c.bf16 %v489_v23, %v485_v22  ;;  %v513_v61 = vld [vmem:[#allocation8 + $0x330] sm:$0xff]  ;;  %v500_v2 = vld [vmem:[#allocation8 + $0x2c8] sm:$0xff]  ;;  %v907_v5 = vpack.c.bf16 %v495_v63, %v491_v58  ;;  %v507_v22 = vld [vmem:[#allocation8 + $0x300] sm:$0xff]  ;;  %v685_v58 = vsub.s32 0, %v1221_v21 }
  0x94   :  { %870 = vmatprep.subr.bf16.mxu0 %v869_v13  ;;  %v486_v13 = vld [vmem:[#allocation8 + $0x258] sm:$0xff]  ;;  %v504_v3 = vld [vmem:[#allocation8 + $0x2e8] sm:$0xff]  ;;  %v979_v4 = vpack.c.bf16 %v513_v61, %v509_v60  ;;  %v511_v23 = vld [vmem:[#allocation8 + $0x320] sm:$0xff]  ;;  %v689_v61 = vsub.s32 1, %v1221_v21 }
  0x95   :  { %v909_v9 = vpack.c.bf16 %v504_v3, %v500_v2  ;;  %v681_v60 = vld [vmem:[%s1262_s4] sm:$0xf]  ;;  %s1136_s4 = smov [#allocation10]  }
  0x96   :  { %960 = vmatpush1.bf16.msra.mxu1 %v959_v6  ;;  %v499_v6 = vld [vmem:[#allocation8 + $0x2c0] sm:$0xff]  ;;  %v686_v63 = vrot.slane %v681_v60, %v685_v58  ;;  %s748_s29 = sshll.u32 %s1136_s4, 4  ;;  %s749_s29 = int_to_ptr.vmem [resolvable:$true] %s748_s29 }
  0x97   :  { %872 = vmatpush1.bf16.msra.mxu0 %v871_v20  ;;  %962 = vmatprep.subr.bf16.mxu1 %v961_v36  ;;  %v965_v20 = vpack.c.bf16 %v490_v14, %v486_v13  ;;  %v521_v36 = vld [vmem:[#allocation8 + $0x370] sm:$0xff]  ;;  %v508_v13 = vld [vmem:[#allocation8 + $0x308] sm:$0xff]  ;;  %v911_v16 = vpack.c.bf16 %v503_v10, %v499_v6  ;;  %s1096_s18 = scalar_lea.vmem %s749_s29, 128  ;;  %p1101_p5 = scmp.lt.s32.totalorder %s749_s29, %s749_s29 }
  0x98   :  { %874 = vmatprep.subr.bf16.mxu0 %v873_v26  ;;  %v494_v26 = vld [vmem:[#allocation8 + $0x298] sm:$0xff]  ;;  %v512_v14 = vld [vmem:[#allocation8 + $0x328] sm:$0xff]  ;;  %v983_v15 = vpack.c.bf16 %v521_v36, %v517_v8  ;;  %p1097_p4 = scmp.ne.s32.totalorder %s749_s29, %s1096_s18  ;;  %p1102_p6 = scmp.lt.s32.totalorder %s1096_s18, %s1096_s18 }
  0x9a   :  { %964 = vmatpush1.bf16.msra.mxu1 %v963_v17  ;;  %p1103_p7 = por %p1102_p6, %p1101_p5 }
  0x9b   :  { %876 = vmatpush1.bf16.msra.mxu0 %v875_v32  ;;  %966 = vmatprep.subr.bf16.mxu1 %v965_v20  ;;  %v969_v32 = vpack.c.bf16 %v498_v27, %v494_v26  ;;  %v913_v20 = vpack.c.bf16 %v512_v14, %v508_v13  ;;  %v915_v27 = vpack.c.bf16 %v511_v23, %v507_v22 }
  0x9c   :  { %878 = vmatprep.subr.bf16.mxu0 %v877_v40  ;;  %v502_v40 = vld [vmem:[#allocation8 + $0x2d8] sm:$0xff]  ;;  %p1104_p8 = pnand %p1103_p7, %p1097_p4 }
  0x9e   :  { %968 = vmatpush1.bf16.msra.mxu1 %v967_v31  ;;  %v519_v31 = vld [vmem:[#allocation8 + $0x360] sm:$0xff] }
  0x9f   :  { %880 = vmatpush1.bf16.msra.mxu0 %v879_v47  ;;  %970 = vmatprep.subr.bf16.mxu1 %v969_v32  ;;  %v973_v47 = vpack.c.bf16 %v506_v41, %v502_v40  ;;  %v919_v32 = vpack.c.bf16 %v519_v31, %v515_v30  ;;  %v532_v40 = vld [vmem:[#allocation8 + $0x3c8] sm:$0xff] }
  0xa0   :  { %882 = vmatprep.subr.bf16.mxu0 %v881_v52  ;;  %v510_v52 = vld [vmem:[#allocation8 + $0x318] sm:$0xff]  ;;  %v536_v41 = vld [vmem:[#allocation8 + $0x3e8] sm:$0xff] }
  0xa1   :  { %v925_v43 = vpack.c.bf16 %v536_v41, %v532_v40 }
  0xa2   :  { %972 = vmatpush1.bf16.msra.mxu1 %v971_v44  ;;  %v538_v44 = vld [vmem:[#allocation8 + $0x3f8] sm:$0xff] }
  0xa3   :  { %884 = vmatpush1.bf16.msra.mxu0 %v883_v59  ;;  %974 = vmatprep.subr.bf16.mxu1 %v973_v47  ;;  %v977_v59 = vpack.c.bf16 %v514_v53, %v510_v52  ;;  %v989_v47 = vpack.c.bf16 %v538_v44, %v534_v42 }
  0xa4   :  { %886 = vmatprep.subr.bf16.mxu0 %v885_v0  ;;  %v518_v0 = vld [vmem:[#allocation8 + $0x358] sm:$0xff] }
  0xa6   :  { %976 = vmatpush1.bf16.msra.mxu1 %v975_v56 }
  0xa7   :  { %888 = vmatpush1.bf16.msra.mxu0 %v887_v7  ;;  %978 = vmatprep.subr.bf16.mxu1 %v977_v59  ;;  %v981_v7 = vpack.c.bf16 %v522_v1, %v518_v0  ;;  %v693_v59 = vsub.s32 2, %v1221_v21  ;;  %v690_v1 = vrot.slane %v681_v60, %v689_v61 }
  0xa8   :  { %890 = vmatprep.subr.bf16.mxu0 %v889_v11  ;;  %v526_v11 = vld [vmem:[#allocation8 + $0x398] sm:$0xff] }
  0xa9   :  { %v985_v17 = vpack.c.bf16 %v530_v12, %v526_v11  ;;  %v694_v0 = vrot.slane %v681_v60, %v693_v59 }
  0xaa   :  { %980 = vmatpush1.bf16.msra.mxu1 %v979_v4 }
  0xab   :  { %892 = vmatpush1.bf16.msra.mxu0 %v891_v18  ;;  %982 = vmatprep.subr.bf16.mxu1 %v981_v7  ;;  %v525_v18 = vld [vmem:[#allocation8 + $0x390] sm:$0xff] }
  0xac   :  { %894 = vmatprep.subr.bf16.mxu0 %v893_v24  ;;  %v516_v24 = vld [vmem:[#allocation8 + $0x348] sm:$0xff]  ;;  %v987_v26 = vpack.c.bf16 %v529_v19, %v525_v18 }
  0xad   :  { %v917_v29 = vpack.c.bf16 %v520_v25, %v516_v24 }
  0xae   :  { %984 = vmatpush1.bf16.msra.mxu1 %v983_v15 }
  0xaf   :  { %896 = vmatpush1.bf16.msra.mxu0 %v895_v33  ;;  %986 = vmatprep.subr.bf16.mxu1 %v985_v17  ;;  %v524_v33 = vld [vmem:[#allocation8 + $0x388] sm:$0xff] }
  0xb0   :  { %898 = vmatprep.subr.bf16.mxu0 %v897_v38  ;;  %v921_v35 = vpack.c.bf16 %v528_v34, %v524_v33  ;;  %v527_v38 = vld [vmem:[#allocation8 + $0x3a0] sm:$0xff] }
  0xb1   :  { %v923_v39 = vpack.c.bf16 %v527_v38, %v523_v37 }
  0xb2   :  { %988 = vmatpush1.bf16.msra.mxu1 %v987_v26 }
  0xb3   :  { %900 = vmatpush1.bf16.msra.mxu0 %v899_v45  ;;  %v531_v45 = vld [vmem:[#allocation8 + $0x3c0] sm:$0xff]  ;;  %990 = vmatprep.subr.bf16.mxu1 %v989_v47 }
  0xb4   :  { %902 = vmatprep.subr.bf16.mxu0 %v901_v50  ;;  %v927_v48 = vpack.c.bf16 %v535_v46, %v531_v45  ;;  %v537_v50 = vld [vmem:[#allocation8 + $0x3f0] sm:$0xff] }
  0xb5   :  { %v991_v51 = vpack.c.bf16 %v537_v50, %v533_v49 }
  0xb7   :  { %904 = vmatpush1.bf16.msra.mxu0 %v903_v57  ;;  %992 = vmatpush1.bf16.msra.mxu1 %v991_v51 }
  0xb8   :  { %906 = vmatprep.subr.bf16.mxu0 %v905_v62  ;;  %v697_v62 = vsub.s32 3, %v1221_v21 }
  0xba   :  { %v698_v2 = vrot.slane %v681_v60, %v697_v62 }
  0xbb   :  { %908 = vmatpush1.bf16.msra.mxu0 %v907_v5 }
  0xbc   :  { %910 = vmatprep.subr.bf16.mxu0 %v909_v9 }
  0xbf   :  { %912 = vmatpush1.bf16.msra.mxu0 %v911_v16 }
  0xc0   :  { %914 = vmatprep.subr.bf16.mxu0 %v913_v20 }
  0xc3   :  { %916 = vmatpush1.bf16.msra.mxu0 %v915_v27 }
  0xc4   :  { %918 = vmatprep.subr.bf16.mxu0 %v917_v29 }
  0xc7   :  { %920 = vmatpush1.bf16.msra.mxu0 %v919_v32 }
  0xc8   :  { %922 = vmatprep.subr.bf16.mxu0 %v921_v35 }
  0xcb   :  { %924 = vmatpush1.bf16.msra.mxu0 %v923_v39 }
  0xcc   :  { %926 = vmatprep.subr.bf16.mxu0 %v925_v43 }
  0xcf   :  { %928 = vmatpush1.bf16.msra.mxu0 %v927_v48 }
 0x165   :  { %v400_v52 = vpop.f32.mrb[2].mxu0 }
 0x166   :  { %v407_v53 = vmul.f32 0.2, %v400_v52  ;;  %v402_v54 = vpop.f32.mrb[3].mxu0  ;;  %vm405_vm1 = vcmp.ge.f32.partialorder %v400_v52, 0.0 }
 0x167   :  { %vm406_vm2 = vcmp.ge.f32.partialorder %v402_v54, 0.0  ;;  %v408_v55 = vmul.f32 0.2, %v402_v54 }
 0x168   :  { %v409_v57 = vsel %vm405_vm1, %v400_v52, %v407_v53 }
 0x169   :  { %v410_v56 = vsel %vm406_vm2, %v402_v54, %v408_v55 }
 0x16a   :  { %603 = vmatprep.mubr.f32.mxu0 %v410_v56  ;;  %674 = vmatprep.mubr.f32.mxu1 %v410_v56 }
 0x16b   :  { %604 = vmatmul.mubr.f32.vlgmr.msra.gmra.mrb[0].mxu0 %v409_v57  ;;  %675 = vmatmul.mubr.f32.vlgmr.msra.gmra.mrb[0].mxu1 %v409_v57 }
 0x23e   :  { %v605_v3 = vpop.f32.mrb[0].mxu0  ;;  %v676_v4 = vpop.f32.mrb[0].mxu1 }
 0x23f   :  { %v703_v5 = vadd.f32 %v686_v63, %v605_v3  ;;  %v705_v6 = vadd.f32 %v694_v0, %v676_v4  ;;  %v607_v7 = vpop.f32.mrb[1].mxu0  ;;  %v678_v8 = vpop.f32.mrb[1].mxu1 }
 0x240   :  { %v704_v36 = vadd.f32 %v690_v1, %v607_v7  ;;  %v706_v9 = vadd.f32 %v698_v2, %v678_v8 }
 0x241   :  { %vm707_vm3 = vcmp.ge.f32.partialorder %v703_v5, 0.0  ;;  %v711_v10 = vmul.f32 0.2, %v703_v5  ;;  %vm709_vm4 = vcmp.ge.f32.partialorder %v705_v6, 0.0  ;;  %v713_v11 = vmul.f32 0.2, %v705_v6 }
 0x242   :  { %vm708_vm5 = vcmp.ge.f32.partialorder %v704_v36, 0.0  ;;  %v712_v12 = vmul.f32 0.2, %v704_v36  ;;  %vm710_vm6 = vcmp.ge.f32.partialorder %v706_v9, 0.0  ;;  %v714_v21 = vmul.f32 0.2, %v706_v9 }
 0x243   :  { %v715_v13 = vsel %vm707_vm3, %v703_v5, %v711_v10  ;;  %v717_v14 = vsel %vm709_vm4, %v705_v6, %v713_v11 }
 0x244   :  { %v716_v15 = vsel %vm708_vm5, %v704_v36, %v712_v12  ;;  %v718_v16 = vsel %vm710_vm6, %v706_v9, %v714_v21 }
 0x245   :  { %v723_v17 = vcombine.low %v715_v13, %v716_v15  ;;  %v724_v18 = vcombine.low %v717_v14, %v718_v16 }
 0x247   :  { %v731_v19 = vrot.slane %v723_v17, %v1224_v28  ;;  %v738_v20 = vrot.slane %v724_v18, %v1224_v28 }
 0x249   :  { %v739_v22 = vcombine.low %v731_v19, %v738_v20 }
 0x24b   :  { %741 = vst [vmem:[#allocation10] sm:$0xff] %v739_v22 }
 0x24c   :  { %1107 = shalt.err (!%p1104_p8)
}
 0x24d   :  { %s1108_s21 = scalar_lea.hbm %s1263_s5, 128 }
 0x24e   :  { %p1109_p9 = scmp.ne.s32.totalorder %s1263_s5, %s1108_s21  ;;  %p1112_p10 = scmp.lt.u32.totalorder %s1108_s21, %s1263_s5 }
 0x250   :  { %p1114_p11 = pnand %p1112_p10, %p1109_p9 }
 0x252   :  { %1117 = shalt.err (!%p1114_p11)
}
 0x253   :  { %751 = dma.vmem_to_hbm [thread:$0]  %s749_s29, 128, %s1263_s5, [#allocation4]  }
 0x254   :  { %1124 = dma.done.wait [#allocation4], 128  }
 0x255   :  { %1125 = vsyncadd [#allocation4], 4294967168 }
 0x256   :  { %755 = vsyncpa [#allocation3], 1 }
 0x257   :  { %756 = vsyncpa [#allocation6], 1 }
 0x258   :  { %757 = vsyncpa [#allocation9], 1 }
 0x259   :  { %758 = vsyncpa [#allocation4], 1 }

</bundles_post_ra>
